<compile_context>
chip_gen: v5e
topology: v5e:2x2
jax: 0.10.0
libtpu: 0.0.40
codegen_flags: <defaults>
</compile_context>

<pallas_src>
import jax
import jax.numpy as jnp
import numpy as np
from jax import lax
from jax.experimental import pallas as pl
from jax.experimental.pallas import tpu as pltpu


def _round_up(x: int, m: int) -> int:
    return ((x + m - 1) // m) * m


def _interp_matrix(in_size: int, out_size: int) -> jnp.ndarray:
    """(out_size, in_size) bilinear interpolation matrix, align_corners=False."""
    scale = in_size / out_size
    o = jnp.arange(out_size, dtype=jnp.float32)
    src = (o + 0.5) * scale - 0.5
    src = jnp.maximum(src, 0.0)                      # PyTorch clamps negatives to 0
    i0 = jnp.floor(src).astype(jnp.int32)
    i0 = jnp.minimum(i0, in_size - 1)
    frac = src - i0.astype(jnp.float32)
    i1 = jnp.minimum(i0 + 1, in_size - 1)
    rows = jnp.arange(out_size)
    w = jnp.zeros((out_size, in_size), jnp.float32)
    w = w.at[rows, i0].add(1.0 - frac)
    w = w.at[rows, i1].add(frac)
    return w


def _make_resize_kernel(w_first: bool):
    """Kernel over a block of B (t,c) slices: x (B, H, W) -> o (B, Ho, Wo_pad)."""

    def kernel(wh_ref, wwt_ref, x_ref, o_ref):
        B, H, W = x_ref.shape
        Ho = wh_ref.shape[0]
        Wo_p = wwt_ref.shape[1]
        wh = wh_ref[...]        # (Ho, H)
        wwt = wwt_ref[...]      # (W, Wo_p)
        x = x_ref[...]          # (B, H, W)

        if w_first:
            # Stage 1 (W direction): ONE flattened MXU dot, M = B*H, N = Wo_p.
            if x.dtype != wwt.dtype:
                x = x.astype(wwt.dtype)
            t = jnp.dot(x.reshape(B * H, W), wwt,
                        preferred_element_type=jnp.float32)      # (B*H, Wo_p) f32
            t = t.reshape(B, H, Wo_p)
            if t.dtype != wh.dtype:
                t = t.astype(wh.dtype)
            # Stage 2 (H direction): ONE batched dot_general (no Python loop).
            wh_b = jnp.broadcast_to(wh[None, :, :], (B, Ho, H))
            out = lax.dot_general(wh_b, t, (((2,), (1,)), ((0,), (0,))),
                                  preferred_element_type=jnp.float32)  # (B,Ho,Wo_p)
            o_ref[...] = out.astype(o_ref.dtype)                 # lane-dense store
        else:
            # Stage 1 (H direction): ONE batched dot_general (no loop/concat).
            if x.dtype != wh.dtype:
                x = x.astype(wh.dtype)
            wh_b = jnp.broadcast_to(wh[None, :, :], (B, Ho, H))
            t = lax.dot_general(wh_b, x, (((2,), (1,)), ((0,), (0,))),
                                preferred_element_type=jnp.float32)    # (B,Ho,W) f32
            # Stage 2 (W direction): ONE flattened dot, M = B*Ho, N = Wo_p.
            t = t.reshape(B * Ho, W)
            if t.dtype != wwt.dtype:
                t = t.astype(wwt.dtype)
            out = jnp.dot(t, wwt,
                          preferred_element_type=jnp.float32)    # (B*Ho, Wo_p)
            o_ref[...] = out.reshape(B, Ho, Wo_p).astype(o_ref.dtype)

    return kernel


def _vmem_capacity_bytes() -> int:
    """Trace-time VMEM capacity query; conservative fallback (v7x per-core)."""
    try:
        info = pltpu.get_tpu_info()
        cap = getattr(info, "vmem_capacity_bytes", None)
        if cap:
            return int(cap)
    except Exception:
        pass
    return 64 * 1024 * 1024


def _const_block_spec(block_shape):
    """BlockSpec for a grid-invariant (constant) input; single-buffered."""
    idx = lambda i: (0,) * len(block_shape)
    try:
        return pl.BlockSpec(block_shape, idx, pipeline_mode=pl.Buffered(1))
    except TypeError:  # older jax without pipeline_mode kwarg
        return pl.BlockSpec(block_shape, idx)


def resize_bilinear(x: jnp.ndarray, size, *, compute_dtype=None) -> jnp.ndarray:
    """F.interpolate(x, size, mode='bilinear', align_corners=False) for TCHW input.

    compute_dtype: optional dtype for the interp matrices / MXU operands.
      Default: bf16 for bf16 inputs, f32 otherwise (matches PyTorch accuracy).
      Pass jnp.bfloat16 explicitly as a fast path for large f32 frames on
      MXU-limited parts (reduced accuracy).
    """
    T, C, H, W = x.shape
    assert C == 3
    if isinstance(size, int):
        Ho = Wo = size
    else:
        Ho, Wo = size
    TC = T * C

    # Lane-dense output: pad the output width to a multiple of 128.
    Wo_pad = _round_up(Wo, 128)

    # Interp matrices in the MXU dtype.
    if compute_dtype is None:
        w_dtype = jnp.bfloat16 if x.dtype == jnp.bfloat16 else jnp.float32
    else:
        w_dtype = jnp.dtype(compute_dtype)
    wh = _interp_matrix(H, Ho).astype(w_dtype)          # (Ho, H)
    wwt = _interp_matrix(W, Wo).T                       # (W, Wo)
    if Wo_pad != Wo:
        wwt = jnp.pad(wwt, ((0, 0), (0, Wo_pad - Wo)))
    wwt = wwt.astype(w_dtype)                           # (W, Wo_pad)

    # Pick the cheaper matmul order (MXU FLOPs, using the padded width it sees).
    cost_w_first = H * Wo_pad * (W + Ho)
    cost_h_first = Ho * W * (H + Wo_pad)
    w_first = cost_w_first <= cost_h_first

    # --- Generation-aware VMEM budget / megacore step requirement ------------
    esize = np.dtype(x.dtype).itemsize
    wsize = np.dtype(w_dtype).itemsize
    vmem_cap = _vmem_capacity_bytes()
    if vmem_cap >= 100 * 1024 * 1024:        # 128 MiB parts (v5e / v6e), 1 TC
        budget = 56 * 1024 * 1024
        vmem_limit = 100 * 1024 * 1024
        min_steps = 2                        # keep the pipeline >= 2 deep
    else:                                    # 64 MiB-per-core parts (v7x), 2 TC
        budget = 24 * 1024 * 1024
        vmem_limit = 48 * 1024 * 1024
        min_steps = 4                        # >= 2 pipelined steps per core

    # Per-(t,c)-slice VMEM footprint (block footprint / B), conservative.
    if w_first:
        inter = (H * W * wsize            # cast copy of x (if dtype differs)
                 + H * Wo_pad * 4         # stage-1 f32 result
                 + H * Wo_pad * wsize     # its cast for stage 2
                 + Ho * H * wsize         # broadcast Wh share
                 + Ho * Wo_pad * 4)       # stage-2 f32 result
    else:
        inter = (H * W * wsize
                 + Ho * H * wsize
                 + Ho * W * 4
                 + Ho * W * wsize
                 + Ho * Wo_pad * 4)
    per_slice = (2 * H * W * esize                      # double-buffered input
                 + 2 * Ho * Wo_pad * esize              # double-buffered output
                 + inter)
    weights_bytes = (Ho * H + W * Wo_pad) * wsize       # single-buffered weights

    b_cap = max(1, (budget - weights_bytes) // per_slice)
    if TC >= min_steps:
        b_cap = max(1, min(b_cap, TC // min_steps))     # enough grid steps

    # --- Choose B: largest divisor of TC if it is close to the cap, else pad.
    B = int(min(b_cap, TC))
    div = 1
    for cand in range(B, 0, -1):
        if TC % cand == 0:
            div = cand
            break
    if div * 4 >= B * 3:          # divisor within 75% of the cap -> no padding
        B = div
        TC_pad = TC
    else:
        TC_pad = _round_up(TC, B)
    grid = (TC_pad // B,)

    x3 = x.reshape(TC, H, W)
    if TC_pad != TC:
        x3 = jnp.pad(x3, ((0, TC_pad - TC), (0, 0), (0, 0)))

    kernel = _make_resize_kernel(w_first)

    flops = 2 * TC_pad * (cost_w_first if w_first else cost_h_first)
    bytes_accessed = (TC_pad * H * W * esize
                      + TC_pad * Ho * Wo_pad * esize
                      + (Ho * H + W * Wo_pad) * wsize)
    cost = pl.CostEstimate(flops=int(flops), transcendentals=0,
                           bytes_accessed=int(bytes_accessed))

    grid_spec = pltpu.PrefetchScalarGridSpec(
        num_scalar_prefetch=0,
        grid=grid,
        in_specs=[
            _const_block_spec((Ho, H)),                       # Wh (constant)
            _const_block_spec((W, Wo_pad)),                   # Ww^T (constant)
            pl.BlockSpec((B, H, W), lambda i: (i, 0, 0)),     # B slices of x
        ],
        out_specs=pl.BlockSpec((B, Ho, Wo_pad), lambda i: (i, 0, 0)),
    )

    out = pl.pallas_call(
        kernel,
        out_shape=jax.ShapeDtypeStruct((TC_pad, Ho, Wo_pad), x.dtype),
        grid_spec=grid_spec,
        compiler_params=pltpu.CompilerParams(
            dimension_semantics=("parallel",),
            vmem_limit_bytes=int(vmem_limit),
        ),
        cost_estimate=cost,
    )(wh, wwt, x3)

    # Crop batch / width padding.  (The width crop could be fused into the
    # consumer at the graph level; kept here for an exact drop-in shape.)
    if TC_pad != TC or Wo_pad != Wo:
        out = out[:TC, :, :Wo]
    return out.reshape(T, C, Ho, Wo)


if __name__ == "__main__":
    key = jax.random.PRNGKey(0)

    # Test 1: downscale (takes the H-first matmul order).
    T, C, H, W = 2, 3, 16, 16
    size = (8, 12)
    x = jax.random.normal(key, (T, C, H, W), dtype=jnp.float32)
    out = jax.block_until_ready(resize_bilinear(x, size))
    ref = jax.image.resize(x, (T, C, *size), method="bilinear", antialias=False)
    assert out.shape == (T, C, *size)
    assert out.dtype == x.dtype
    assert jnp.max(jnp.abs(out - ref)) < 1e-3

    # Test 2: asymmetric resize (takes the W-first matmul order).
    x2 = jax.random.normal(jax.random.PRNGKey(1), (2, 3, 8, 256), dtype=jnp.float32)
    size2 = (64, 32)
    out2 = jax.block_until_ready(resize_bilinear(x2, size2))
    ref2 = jax.image.resize(x2, (2, 3, *size2), method="bilinear", antialias=False)
    assert out2.shape == (2, 3, *size2)
    assert jnp.max(jnp.abs(out2 - ref2)) < 1e-3

    # Test 3: bf16 inputs ride the native bf16 MXU path (looser tolerance).
    xb = x.astype(jnp.bfloat16)
    outb = jax.block_until_ready(resize_bilinear(xb, size))
    refb = jax.image.resize(xb.astype(jnp.float32), (T, C, *size),
                            method="bilinear", antialias=False)
    assert outb.dtype == jnp.bfloat16
    assert jnp.max(jnp.abs(outb.astype(jnp.float32) - refb)) < 1e-1

    print("KERNEL_OK")
</pallas_src>

<mosaic_0001>
module attributes {stable_mosaic.version = 11 : i64} {
  func.func @kernel(%arg0: i32, %arg1: memref<8x16xf32, #tpu.memory_space<vmem>>, %arg2: memref<16x128xf32, #tpu.memory_space<vmem>>, %arg3: memref<1x16x16xf32, #tpu.memory_space<vmem>>, %arg4: memref<1x8x128xf32, #tpu.memory_space<vmem>>) attributes {dimension_semantics = [#tpu.dimension_semantics<parallel>], iteration_bounds = array<i64: 6>, scalar_prefetch = 0 : i64, scratch_operands = 0 : i64, tpu.core_type = #tpu.core_type<tc>, window_params = [{pipeline_mode = #tpu.pipeline_mode<synchronous>, transform_indices = @transform_0, window_bounds = array<i64: 8, 16>}, {pipeline_mode = #tpu.pipeline_mode<synchronous>, transform_indices = @transform_1, window_bounds = array<i64: 16, 128>}, {transform_indices = @transform_2, window_bounds = array<i64: 1, 16, 16>}, {transform_indices = @transform_3, window_bounds = array<i64: 1, 8, 128>}]} {
    %c0 = arith.constant 0 : index
    %c0_0 = arith.constant 0 : index
    %0 = vector.load %arg1[%c0, %c0_0] : memref<8x16xf32, #tpu.memory_space<vmem>>, vector<8x16xf32>
    %c0_1 = arith.constant 0 : index
    %c0_2 = arith.constant 0 : index
    %1 = vector.load %arg2[%c0_1, %c0_2] : memref<16x128xf32, #tpu.memory_space<vmem>>, vector<16x128xf32>
    %c0_3 = arith.constant 0 : index
    %c0_4 = arith.constant 0 : index
    %c0_5 = arith.constant 0 : index
    %2 = vector.load %arg3[%c0_3, %c0_4, %c0_5] : memref<1x16x16xf32, #tpu.memory_space<vmem>>, vector<1x16x16xf32>
    %3 = vector.shape_cast %0 : vector<8x16xf32> to vector<1x8x16xf32>
    %cst = arith.constant dense<0.000000e+00> : vector<1x8x16xf32>
    %4 = tpu.matmul %3, %2, %cst {dimension_numbers = #tpu.dot_dimension_numbers<[2], [1], [1], [2], [0, 0, 0, 1, 1, 2], [0], [0]>} : vector<1x8x16xf32>, vector<1x16x16xf32>, vector<1x8x16xf32> -> vector<1x8x16xf32>
    %5 = vector.shape_cast %4 : vector<1x8x16xf32> to vector<8x16xf32>
    %cst_6 = arith.constant dense<0.000000e+00> : vector<8x128xf32>
    %6 = tpu.matmul %5, %1, %cst_6 {dimension_numbers = #tpu.dot_dimension_numbers<[1], [0], [0], [1], [0, 0, 1, 1], [], []>} : vector<8x16xf32>, vector<16x128xf32>, vector<8x128xf32> -> vector<8x128xf32>
    %7 = vector.shape_cast %6 : vector<8x128xf32> to vector<1x8x128xf32>
    %c0_7 = arith.constant 0 : index
    %c0_8 = arith.constant 0 : index
    %c0_9 = arith.constant 0 : index
    %8 = vector.load %arg4[%c0_7, %c0_8, %c0_9] : memref<1x8x128xf32, #tpu.memory_space<vmem>>, vector<1x8x128xf32>
    tpu.vector_store %arg4[%c0_7, %c0_8, %c0_9], %7 {strides = array<i32>} : memref<1x8x128xf32, #tpu.memory_space<vmem>>, vector<1x8x128xf32>,
    return
  }
  func.func @transform_0(%arg0: i32) -> (i32, i32) {
    %c0_i32 = arith.constant 0 : i32
    %c0_i32_0 = arith.constant 0 : i32
    %c0_i32_1 = arith.constant 0 : i32
    return %c0_i32, %c0_i32_0 : i32, i32
  }
  func.func @transform_1(%arg0: i32) -> (i32, i32) {
    %c0_i32 = arith.constant 0 : i32
    %c0_i32_0 = arith.constant 0 : i32
    %c0_i32_1 = arith.constant 0 : i32
    return %c0_i32, %c0_i32_0 : i32, i32
  }
  func.func @transform_2(%arg0: i32) -> (i32, i32, i32) {
    %c0_i32 = arith.constant 0 : i32
    %c0_i32_0 = arith.constant 0 : i32
    %c0_i32_1 = arith.constant 0 : i32
    return %arg0, %c0_i32, %c0_i32_0 : i32, i32, i32
  }
  func.func @transform_3(%arg0: i32) -> (i32, i32, i32) {
    %c0_i32 = arith.constant 0 : i32
    %c0_i32_0 = arith.constant 0 : i32
    %c0_i32_1 = arith.constant 0 : i32
    return %arg0, %c0_i32, %c0_i32_0 : i32, i32, i32
  }
}

</mosaic_0001>

<bundles_post_ra>
// kernel: tpu_custom_call.1
= control target key start
LH: loop header
LB: loop body
LE: loop exit
PB: predicated region body
PF: predicated region fallthrough
CT: control target
= control target key end

     0   :  { %s812_s0 = inlined_call_operand.hbm [shape: f32[8,16], index: 0, kind: input, shape index: {}]   ;;  %s813_s1 = inlined_call_operand.hbm [shape: f32[16,128], index: 1, kind: input, shape index: {}]   ;;  %s814_s2 = inlined_call_operand.hbm [shape: f32[6,16,16], index: 2, kind: input, shape index: {}]   ;;  %s815_s3 = inlined_call_operand.hbm [shape: f32[6,8,128], index: 3, kind: output, shape index: {}]  }
   0x1   :  { %816 = sst [smem:[#allocation13_spill]] %s812_s0 }
   0x2   :  { %817 = sst [smem:[#allocation14_spill]] %s813_s1 }
   0x3   :  { %8 = vsyncpa [#allocation3], 0 }
   0x4   :  { %9 = vsyncpa [#allocation6], 0 }
   0x5   :  { %10 = vsyncpa [#allocation4], 0 }
   0x6   :  { %12 = vsyncpa [#allocation4 + $0x1], 0  ;;  %s657_s12 = smov 0   ;;  %s659_s13 = smov 0  }
   0x7   :  { %s661_s14 = smov 0   ;;  %s663_s15 = smov 0  }
   0x8 LB: > { %s678_s16 = sadd.s32 4294967295, %s631_s15   ;;  %s378_s17 = sadd.s32 4294967294, %s631_s15   ;;  %s631_s15 = sphi %s663_s15, %s829_s15   ;;  %s627_s14 = sphi %s661_s14, %s828_s14   ;;  %s623_s13 = sphi %s659_s13, %s827_s13   ;;  %s619_s12 = sphi %s657_s12, %s826_s12  }
   0x9   : > { %s682_s18 = sadd.s32 1, %s631_s15   ;;  %s67_s19 = sadd.s32 1, %s627_s14 }
   0xa   : > { %s64_s20 = ssub.s32 %s631_s15, %s682_s18  ;;  %p74_p0 = scmp.ne.s32.totalorder %s627_s14, %s623_s13 }
   0xb   : > { %p65_p1 = scmp.eq.s32.totalorder %s64_s20, 0  ;;  %p75_p2 = scmp.eq.s32.totalorder %s631_s15, 0 }
   0xc   : > { %p80_p3 = scmp.ne.s32.totalorder %s623_s13, %s619_s12  ;;  %p81_p4 = scmp.eq.s32.totalorder %s678_s16, 0 }
   0xd   : > { %s694_s21 = scalar_select %p65_p1, %s627_s14, %s67_s19  }
   0xe   : > { %p696_p5 = por %p75_p2, %p74_p0  ;;  %p702_p6 = por %p81_p4, %p80_p3 }
   0xf   : > { %p104_p7 = scmp.eq.s32.totalorder %s678_s16, 5  ;;  %p110_p8 = scmp.eq.s32.totalorder %s378_s17, 5 }
  0x10   : > { %p379_p9 = scmp.ge.s32.totalorder %s631_s15, 1  ;;  %p117_p10 = scmp.lt.s32.totalorder %s631_s15, 7 }
  0x11   : > { %p709_p11 = por %p104_p7, %p74_p0  ;;  %p713_p12 = por %p110_p8, %p80_p3 }
  0x12   : > { %p717_p13 = pnand %p379_p9, %p117_p10  ;;  %s823_s0 = sld [smem:[#allocation13_spill]] }
  0x13   : > { %s633_s30 = smov [#allocation2]   ;;  %p427_p2 = scmp.lt.s32.totalorder %s631_s15, 6 }
  0x14   : > { %p410_p1 = pneg %p717_p13  ;;  %s131_s4 = sshll.u32 %s633_s30, 4  ;;  %s132_s4 = int_to_ptr.vmem [resolvable:$true] %s131_s4 }
  0x15   : > { %s824_s1 = sld [smem:[#allocation14_spill]]  ;;  %p734_p3 = pnand %p427_p2, %p696_p5 }
  0x16   : > { %p411_p0 = pnand %p410_p1, %p81_p4  ;;  %s634_s9 = smov [#allocation5]  }
  0x17   : > { %s142_s10 = sshll.u32 %s634_s9, 4  ;;  %s156_s11 = sand.u32 1, %s631_s15   ;;  %s143_s10 = int_to_ptr.vmem [resolvable:$true] %s142_s10 }
  0x18   : > { %s129_s29 = sshll.u32 %s823_s0, 4  ;;  %s635_s17 = smov 128   ;;  %s130_s29 = int_to_ptr.hbm [resolvable:$true] %s129_s29 }
  0x19   : > { %413 = dma.hbm_to_vmem [thread:$0]  (!%p411_p0), %s130_s29, 128, %s132_s4, [#allocation3]  }
  0x1a   : > { %s636_s19 = smov 8   ;;  %s158_s20 = sand.u32 1, %s627_s14  }
  0x1b   : > { %s140_s7 = sshll.u32 %s824_s1, 4  ;;  %s383_s27 = sshll.u32 %s158_s20, 4  ;;  %s141_s7 = int_to_ptr.hbm [resolvable:$true] %s140_s7 }
  0x1c   : > { %416 = dma.hbm_to_vmem [thread:$0]  (!%p411_p0), %s141_s7, 256, %s143_s10, [#allocation6], %s635_s17, %s635_s17, %s636_s19  }
  0x1d   : > { %s397_s28 = sshll.u32 %s631_s15, 4  ;;  %s160_s5 = scalar_lea.vmem [#allocation7], %s383_s27 }
  0x1e   : > { %s165_s30 = scalar_lea.hbm %s814_s2, %s397_s28  ;;  %s168_s6 = sshll.u32 %s160_s5, 4  ;;  %s169_s6 = int_to_ptr.vmem [resolvable:$true] %s168_s6 }
  0x1f   : > { %s166_s4 = sshll.u32 %s165_s30, 4  ;;  %s157_s9 = scalar_lea.sflag [#allocation3], %s156_s11  ;;  %s167_s4 = int_to_ptr.hbm [resolvable:$true] %s166_s4 }
  0x20   : > { %s527_s0 = sshra.s32 %s167_s4, 4  ;;  %p531_p7 = pneg %p734_p3  ;;  %s528_s0 = int_to_ptr.hbm [resolvable:$true] %s527_s0 }
  0x21   : > { %s529_s1 = scalar_lea.hbm %s528_s0, 16  ;;  %s534_s20 = scalar_lea.hbm %s814_s2, 96 }
  0x22   : > { %p530_p5 = scmp.ne.s32.totalorder %s528_s0, %s529_s1  ;;  %p535_p10 = scmp.lt.s32.totalorder %s528_s0, %s814_s2 }
  0x23   : > { %p536_p1 = scmp.lt.s32.totalorder %s534_s20, %s529_s1 }
  0x24   : > { %p532_p8 = pnand %p531_p7, %p530_p5 }
  0x25   : > { %p537_p0 = por %p536_p1, %p535_p10 }
  0x26   : > { %p533_p9 = pneg %p532_p8 }
  0x28   : > { %p538_p2 = pnand %p537_p0, %p533_p9 }
  0x2a   : > { %541 = shalt.err (!%p538_p2)
}
  0x2b   : > { %420 = dma.hbm_to_vmem [thread:$0]  (!%p734_p3), %s167_s4, 256, %s169_s6, %s157_s9, %s635_s17, %s635_s17, %s636_s19  }
  0x2c   : > { %180 = sbr.rel (%p717_p13) target bundleno = 315 (0x13b), region = 32 }
  0x31   : > { %602 = dma.done.wait (%p81_p4), [#allocation3], 128  }
  0x32   : > { %604 = vsyncadd (%p81_p4), [#allocation3], 4294967168 }
  0x33   : > { %606 = dma.done.wait (%p81_p4), [#allocation6], 256  }
  0x34   : > { %608 = vsyncadd (%p81_p4), [#allocation6], 4294967040  ;;  %s192_s0 = sand.u32 1, %s678_s16   ;;  %s772_s1 = sand.u32 1, %s623_s13  }
  0x35   : > { %s389_s26 = sshll.u32 %s772_s1, 4  ;;  %s193_s8 = scalar_lea.sflag [#allocation3], %s192_s0 }
  0x36   : > { %s196_s11 = scalar_lea.vmem [#allocation7], %s389_s26 }
  0x37   : > { %610 = dma.done.wait (%p702_p6), %s193_s8, 256  }
  0x38   : > { %612 = vsyncadd (%p702_p6), %s193_s8, 4294967040  ;;  %v224_v0 = vld [vmem:[%s196_s11 + $0x8] sm:$0xff]  ;;  %v223_v1 = vld [vmem:[%s196_s11] sm:$0xff]  ;;  %vm225_vm0 = vcmask 130048   ;;  %s390_s17 = sshll.u32 %s772_s1, 3  ;;  %s394_s23 = sshll.u32 %s678_s16, 3 }
  0x39   : > { %243 = vmatpush.msra.mxu0 %v224_v0  ;;  %v220_v2 = vld [vmem:[#allocation2] sm:$0xff]  ;;  %v222_v3 = vld [vmem:[#allocation5 + $0x8] sm:$0xff]  ;;  %v221_v4 = vld [vmem:[#allocation5] sm:$0xff]  ;;  %s284_s22 = scalar_lea.hbm %s815_s3, %s394_s23  ;;  %s219_s30 = scalar_lea.vmem [#allocation8], %s390_s17 }
  0x3a   : > { %266 = vmatpush.msra.mxu1 %v222_v3  ;;  %s286_s4 = sshll.u32 %s219_s30, 4  ;;  %s288_s5 = sshll.u32 %s284_s22, 4  ;;  %s287_s4 = int_to_ptr.vmem [resolvable:$true] %s286_s4  ;;  %s289_s5 = int_to_ptr.hbm [resolvable:$true] %s288_s5 }
  0x3b   : > { %244 = vmatpush.msra.mxu0 %v223_v1  ;;  %s274_s6 = scalar_lea.sflag [#allocation4], %s772_s1  ;;  %s571_s9 = sshra.s32 %s289_s5, 4  ;;  %s572_s9 = int_to_ptr.hbm [resolvable:$true] %s571_s9 }
  0x3c   : > { %391 = vmatmul.msk.f32.vlgmr.msra.gmra.mxu0 %vm225_vm0, %v220_v2  ;;  %267 = vmatpush.msra.mxu1 %v221_v4  ;;  %s573_s7 = scalar_lea.hbm %s572_s9, 8  ;;  %s577_s20 = scalar_lea.hbm %s815_s3, 48 }
  0x3d   : > { %p574_p4 = scmp.ne.s32.totalorder %s572_s9, %s573_s7  ;;  %p578_p3 = scmp.lt.s32.totalorder %s572_s9, %s815_s3 }
  0x3e   : > { %p579_p5 = scmp.lt.s32.totalorder %s577_s20, %s573_s7 }
  0x3f   : > { %p575_p6 = pnand %p574_p4, %p709_p11 }
  0x40   : > { %p580_p7 = por %p579_p5, %p578_p3 }
  0x41   : > { %p576_p13 = pneg %p575_p6 }
  0x43   : > { %p581_p8 = pnand %p580_p7, %p576_p13 }
  0xb9   : > { %v246_v5 = vpop.f32.mrf.mxu0 }
  0xba   : > { %392 = vmatmul.msk.f32.vlgmr.msra.gmra.mxu1 %vm225_vm0, %v246_v5 }
 0x137   : > { %v269_v6 = vpop.f32.mrf.mxu1 }
 0x138   : > { %272 = vst [vmem:[%s219_s30] sm:$0xff] %v269_v6 }
 0x139   : > { %584 = shalt.err (!%p581_p8)
}
 0x13a   : > { %408 = dma.vmem_to_hbm [thread:$0]  (%p709_p11), %s287_s4, 128, %s289_s5, %s274_s6  }
 0x13b PF: > { %p430_p9 = scmp.ge.s32.totalorder %s631_s15, 2  ;;  %s300_s0 = sand.u32 1, %s619_s12  }
 0x13c   : > { %s301_s1 = scalar_lea.sflag [#allocation4], %s300_s0 }
 0x13d   : > { %p422_p10 = pnand %p430_p9, %p713_p12 }
 0x13f   : > { %p423_p1 = pneg %p422_p10 }
 0x141   : > { %614 = dma.done.wait (%p423_p1), %s301_s1, 128  }
 0x142   : > { %616 = vsyncadd (%p423_p1), %s301_s1, 4294967168  ;;  %p15_p0 = scmp.ge.s32.totalorder %s682_s18, 8   ;;  %s826_s12 = smov %s623_s13 }
 0x143   : > { %s827_s13 = smov %s627_s14  ;;  %s828_s14 = smov %s694_s21 }
 0x144   : > { %s829_s15 = smov %s682_s18  ;;  %17 = sbr.rel (!%p15_p0) target bundleno = 8 (0x8), region = 84 }
 0x149   :  { %307 = vsyncpa [#allocation3], 1 }
 0x14a   :  { %309 = vsyncpa [#allocation3 + $0x1], 1 }
 0x14b   :  { %310 = vsyncpa [#allocation6], 1 }
 0x14c   :  { %311 = vsyncpa [#allocation4], 1 }
 0x14d   :  { %313 = vsyncpa [#allocation4 + $0x1], 1 }

</bundles_post_ra>
